<compile_context>
chip_gen: v6e
topology: v6e:2x2x1
jax: 0.10.0
libtpu: 0.0.40
codegen_flags: <defaults>
</compile_context>

<pallas_src>
import jax
import jax.numpy as jnp
from jax.experimental import pallas as pl
from jax.experimental.pallas import tpu as pltpu

_LANES = 128                            # vreg lane width: last dim stays lane-dense
_BASE_TILE_BYTES = 2048 * _LANES * 4    # ~1 MiB per buffer: HBM-efficiency plateau
_SMALL_FALLBACK_ELEMS = 16 * 1024       # below this, plain XLA add wins


def _pcquery_add_kernel(x_ref, y_ref, o_ref):
    # Elementwise add on a lane-dense (tr, 128) tile.
    o_ref[...] = x_ref[...] + y_ref[...]


def _sublane_rows(itemsize):
    # Sub-32-bit dtypes pack 2/4 rows per sublane.
    return {4: 8, 2: 16, 1: 32}.get(itemsize, 8)


def pcquery_layer(input_xyzs, query_xyz_index,
                  input_xyz_num=None, query_xyz_num=None,
                  query_method="ball", query_num=16, radius=0.5,
                  tile_rows=None,
                  small_fallback_elems=_SMALL_FALLBACK_ELEMS):
    """Pallas equivalent of PCQueryLayer.forward.

    The metadata args are accepted for API parity but (as in the PyTorch
    reference forward) do not affect the computation.
    """
    assert input_xyzs.shape == query_xyz_index.shape, \
        "PCQuery.forward adds the two tensors elementwise; shapes must match"

    # Match torch's type promotion (exact for float/float; mixed int/float
    # corner cases may differ slightly from torch, which is acceptable here).
    out_dtype = jnp.promote_types(input_xyzs.dtype, query_xyz_index.dtype)
    x = input_xyzs.astype(out_dtype)
    y = query_xyz_index.astype(out_dtype)

    orig_shape = x.shape
    total = x.size
    itemsize = jnp.dtype(out_dtype).itemsize

    # Tiny inputs: fixed pallas_call dispatch + reshape overhead dwarfs the
    # ~1 us of HBM traffic; XLA's fused add is strictly faster.
    if total < max(small_fallback_elems, _LANES):
        return x + y

    rows = total // _LANES          # aligned-prefix rows (no padding copies)
    main = rows * _LANES
    tail = total - main             # < 128 leftover elements

    xf = x.reshape(-1)
    yf = y.reshape(-1)
    if tail:
        x2 = xf[:main].reshape(rows, _LANES)
        y2 = yf[:main].reshape(rows, _LANES)
    else:
        x2 = xf.reshape(rows, _LANES)   # pure metadata reshape, zero-copy path
        y2 = yf.reshape(rows, _LANES)

    sub = _sublane_rows(itemsize)
    # ~1 MiB per tile buffer regardless of dtype (2048 rows f32, 4096 bf16, ...).
    default_tr = max(sub, _BASE_TILE_BYTES // (_LANES * itemsize))
    tr = default_tr if tile_rows is None else int(tile_rows)
    tr = min(tr, rows)

    if rows > sub:
        # Guarantee >= 2 grid steps so v7x's two TensorCores both get work
        # (harmless on single-TC v5e/v6e; also halves exposed per-step cost).
        half = max(sub, (pl.cdiv(rows, 2) // sub) * sub)
        tr = min(tr, half)
        tr = max(sub, (tr // sub) * sub)    # sublane-aligned block rows
    else:
        tr = rows                           # single full-extent block

    grid = (pl.cdiv(rows, tr),)
    spec = pl.BlockSpec((tr, _LANES), lambda i: (i, 0))

    # Only raise scoped VMEM when a user-supplied tile_rows actually needs it
    # (3 arrays x 2 buffers); the default ~6 MiB footprint fits every
    # generation's default scoped-VMEM limit.
    working_set = 3 * 2 * tr * _LANES * itemsize
    compiler_kwargs = dict(dimension_semantics=("parallel",))
    if working_set > (12 << 20):
        compiler_kwargs["vmem_limit_bytes"] = min(working_set + (2 << 20), 48 << 20)

    out2 = pl.pallas_call(
        _pcquery_add_kernel,
        out_shape=jax.ShapeDtypeStruct((rows, _LANES), out_dtype),
        grid=grid,
        in_specs=[spec, spec],
        out_specs=spec,
        compiler_params=pltpu.CompilerParams(**compiler_kwargs),
        cost_estimate=pl.CostEstimate(
            flops=main,
            transcendentals=0,
            bytes_accessed=3 * main * itemsize),
    )(x2, y2)

    out_flat = out2.reshape(-1)
    if tail:
        # Handle the sub-128-element tail with a plain add; no full-array
        # pad/slice round trips through HBM.
        out_flat = jnp.concatenate([out_flat, xf[main:] + yf[main:]])
    return out_flat.reshape(orig_shape)


if __name__ == "__main__":
    key = jax.random.PRNGKey(0)
    k1, k2, k3, k4 = jax.random.split(key, 4)

    # 1) Moderate, lane-aligned point cloud: exercises the Pallas path.
    B, N, C = 2, 4096, 3
    input_xyzs = jax.random.normal(k1, (B, N, C), dtype=jnp.float32)
    query_xyz_index = jax.random.normal(k2, (B, N, C), dtype=jnp.float32)
    out = pcquery_layer(
        input_xyzs, query_xyz_index,
        input_xyz_num=N, query_xyz_num=N,
        query_method="ball", query_num=16, radius=0.5,
    )
    out = jax.block_until_ready(out)
    ref = input_xyzs + query_xyz_index
    assert out.shape == ref.shape and out.dtype == ref.dtype
    assert jnp.allclose(out, ref, atol=1e-6), "mismatch vs reference add (aligned)"

    # 2) Non-128-aligned total: aligned prefix via Pallas + tiny tail via XLA.
    B2, N2, C2 = 2, 4099, 3
    xa = jax.random.normal(k3, (B2, N2, C2), dtype=jnp.float32)
    ya = jax.random.normal(k4, (B2, N2, C2), dtype=jnp.float32)
    out2 = jax.block_until_ready(pcquery_layer(xa, ya))
    assert jnp.allclose(out2, xa + ya, atol=1e-6), "mismatch vs reference add (ragged)"

    # 3) Tiny input (original example size): wrapper falls back to plain XLA add.
    xs = jax.random.normal(k1, (2, 128, 3), dtype=jnp.float32)
    ys = jax.random.normal(k2, (2, 128, 3), dtype=jnp.float32)
    outs = jax.block_until_ready(pcquery_layer(xs, ys))
    assert jnp.allclose(outs, xs + ys, atol=1e-6), "mismatch vs reference add (tiny)"

    print("KERNEL_OK")
</pallas_src>

<mosaic_0001>
module attributes {stable_mosaic.version = 11 : i64} {
  func.func @_pcquery_add_kernel(%arg0: i32, %arg1: memref<96x128xf32, #tpu.memory_space<vmem>>, %arg2: memref<96x128xf32, #tpu.memory_space<vmem>>, %arg3: memref<96x128xf32, #tpu.memory_space<vmem>>) attributes {dimension_semantics = [#tpu.dimension_semantics<parallel>], iteration_bounds = array<i64: 2>, scalar_prefetch = 0 : i64, scratch_operands = 0 : i64, tpu.core_type = #tpu.core_type<tc>, window_params = [{transform_indices = @transform_0, window_bounds = array<i64: 96, 128>}, {transform_indices = @transform_1, window_bounds = array<i64: 96, 128>}, {transform_indices = @transform_2, window_bounds = array<i64: 96, 128>}]} {
    %c0 = arith.constant 0 : index
    %c0_0 = arith.constant 0 : index
    %0 = vector.load %arg1[%c0, %c0_0] : memref<96x128xf32, #tpu.memory_space<vmem>>, vector<96x128xf32>
    %c0_1 = arith.constant 0 : index
    %c0_2 = arith.constant 0 : index
    %1 = vector.load %arg2[%c0_1, %c0_2] : memref<96x128xf32, #tpu.memory_space<vmem>>, vector<96x128xf32>
    %2 = arith.addf %0, %1 : vector<96x128xf32>
    %c0_3 = arith.constant 0 : index
    %c0_4 = arith.constant 0 : index
    %3 = vector.load %arg3[%c0_3, %c0_4] : memref<96x128xf32, #tpu.memory_space<vmem>>, vector<96x128xf32>
    tpu.vector_store %arg3[%c0_3, %c0_4], %2 {strides = array<i32>} : memref<96x128xf32, #tpu.memory_space<vmem>>, vector<96x128xf32>,
    return
  }
  func.func @transform_0(%arg0: i32) -> (i32, i32) {
    %c0_i32 = arith.constant 0 : i32
    %c0_i32_0 = arith.constant 0 : i32
    return %arg0, %c0_i32 : i32, i32
  }
  func.func @transform_1(%arg0: i32) -> (i32, i32) {
    %c0_i32 = arith.constant 0 : i32
    %c0_i32_0 = arith.constant 0 : i32
    return %arg0, %c0_i32 : i32, i32
  }
  func.func @transform_2(%arg0: i32) -> (i32, i32) {
    %c0_i32 = arith.constant 0 : i32
    %c0_i32_0 = arith.constant 0 : i32
    return %arg0, %c0_i32 : i32, i32
  }
}

</mosaic_0001>

<bundles_post_ra>
// kernel: tpu_custom_call.1
= control target key start
LH: loop header
LB: loop body
LE: loop exit
PB: predicated region body
PF: predicated region fallthrough
CT: control target
= control target key end

     0   :  { %7 = vsyncpa [#allocation3], 0  ;;  %s836_s0 = inlined_call_operand.hbm [shape: f32[192,128], index: 0, kind: input, shape index: {}]   ;;  %s837_s1 = inlined_call_operand.hbm [shape: f32[192,128], index: 1, kind: input, shape index: {}]   ;;  %s838_s2 = inlined_call_operand.hbm [shape: f32[192,128], index: 2, kind: output, shape index: {}]  }
   0x1   :  { %9 = vsyncpa [#allocation3 + $0x1], 0 }
   0x2   :  { %10 = vsyncpa [#allocation6], 0 }
   0x3   :  { %12 = vsyncpa [#allocation6 + $0x1], 0 }
   0x4   :  { %13 = vsyncpa [#allocation4], 0 }
   0x5   :  { %15 = vsyncpa [#allocation4 + $0x1], 0  ;;  %s581_s9 = smov 0   ;;  %s583_s10 = smov 0  }
   0x6   :  { %s585_s11 = smov 0   ;;  %s587_s12 = smov 0  }
   0x7 LB: > { %s602_s13 = sadd.s32 4294967295, %s557_s12   ;;  %s363_s14 = sadd.s32 4294967294, %s557_s12   ;;  %s557_s12 = sphi %s587_s12, %s853_s12   ;;  %s553_s11 = sphi %s585_s11, %s852_s11   ;;  %s549_s10 = sphi %s583_s10, %s851_s10   ;;  %s545_s9 = sphi %s581_s9, %s850_s9  }
   0x8   : > { %s606_s15 = sadd.s32 1, %s557_s12   ;;  %s28_s16 = sadd.s32 1, %s553_s11 }
   0x9   : > { %s25_s17 = ssub.s32 %s557_s12, %s606_s15  ;;  %p35_p0 = scmp.ne.s32.totalorder %s553_s11, %s549_s10 }
   0xa   : > { %p26_p1 = scmp.eq.s32.totalorder %s25_s17, 0  ;;  %p36_p2 = scmp.eq.s32.totalorder %s557_s12, 0 }
   0xb   : > { %p41_p3 = scmp.ne.s32.totalorder %s549_s10, %s545_s9  ;;  %p42_p4 = scmp.eq.s32.totalorder %s602_s13, 0 }
   0xc   : > { %s618_s18 = scalar_select %p26_p1, %s553_s11, %s28_s16  }
   0xd   : > { %p37_p5 = por %p36_p2, %p35_p0  ;;  %p620_p6 = por %p42_p4, %p41_p3 }
   0xe   : > { %p91_p7 = scmp.eq.s32.totalorder %s602_s13, 1  ;;  %p97_p8 = scmp.eq.s32.totalorder %s363_s14, 1 }
   0xf   : > { %s841_s19 = scalar_select %p620_p6, 1, 0 }
  0x10   : > { %p395_p10 = scmp.lt.s32.totalorder %s557_s12, 2  ;;  %p627_p11 = por %p91_p7, %p35_p0 }
  0x11   : > { %p631_p12 = por %p97_p8, %p41_p3  ;;  %s636_s22 = sand.u32 1, %s553_s11  }
  0x12   : > { %s842_s20 = scalar_select %p627_p11, 1, 0 }
  0x13   : > { %s843_s21 = scalar_select %p631_p12, 1, 0 }
  0x14   : > { %s372_s23 = smul.u32 1536, %s557_s12  ;;  %p647_p13 = pnand %p395_p10, %p37_p5 }
  0x15   : > { %s375_s24 = smul.u32 96, %s636_s22  ;;  %s118_s3 = scalar_lea.sflag [#allocation3], %s636_s22 }
  0x16   : > { %s645_s27 = scalar_lea.hbm %s836_s0, %s372_s23  ;;  %p435_p1 = pneg %p647_p13 }
  0x17   : > { %s121_s29 = scalar_lea.vmem [#allocation2], %s375_s24  ;;  %s433_s4 = scalar_lea.hbm %s645_s27, 1536 }
  0x18   : > { %s128_s30 = sshll.u32 %s121_s29, 4  ;;  %p434_p0 = scmp.ne.s32.totalorder %s645_s27, %s433_s4  ;;  %s653_s30 = int_to_ptr.vmem [resolvable:$true] %s128_s30 }
  0x19   : > { %s438_s7 = scalar_lea.hbm %s836_s0, 3072  ;;  %p439_p4 = scmp.lt.s32.totalorder %s645_s27, %s836_s0 }
  0x1a   : > { %p436_p2 = pnand %p435_p1, %p434_p0  ;;  %p440_p5 = scmp.lt.s32.totalorder %s438_s7, %s433_s4 }
  0x1c   : > { %p437_p3 = pneg %p436_p2  ;;  %p441_p7 = por %p440_p5, %p439_p4 }
  0x1e   : > { %p442_p8 = pnand %p441_p7, %p437_p3 }
  0x20   : > { %445 = shalt.err (!%p442_p8)
}
  0x21   : > { %s446_s16 = scalar_lea.vmem %s653_s30, 1536  ;;  %s559_s17 = smov [#allocation2]  }
  0x22   : > { %p447_p10 = scmp.ne.s32.totalorder %s653_s30, %s446_s16  ;;  %s451_s25 = sshll.u32 %s559_s17, 4  ;;  %s452_s25 = int_to_ptr.vmem [resolvable:$false] %s451_s25 }
  0x23   : > { %s453_s26 = scalar_lea.vmem %s452_s25, 3072  ;;  %p454_p9 = scmp.lt.s32.totalorder %s653_s30, %s452_s25 }
  0x24   : > { %p449_p0 = pnand %p447_p10, %p435_p1  ;;  %p455_p12 = scmp.lt.s32.totalorder %s453_s26, %s446_s16 }
  0x26   : > { %p450_p2 = pneg %p449_p0  ;;  %p456_p11 = por %p455_p12, %p454_p9 }
  0x28   : > { %p457_p4 = pnand %p456_p11, %p450_p2 }
  0x2a   : > { %460 = shalt.err (!%p457_p4)
}
  0x2b   : > { %s560_s29 = smov 128   ;;  %s561_s4 = smov 8  }
  0x2c   : > { %387 = dma.hbm_to_vmem [thread:$0]  (!%p647_p13), %s645_s27, 1536, %s653_s30, %s118_s3, %s560_s29, %s560_s29, %s561_s4  }
  0x2d   : > { %p368_p9 = scmp.ge.s32.totalorder %s557_s12, 1  ;;  %p157_p11 = scmp.lt.s32.totalorder %s557_s12, 3 }
  0x2e   : > { %s696_s8 = scalar_lea.hbm %s837_s1, %s372_s23  ;;  %s142_s14 = scalar_lea.vmem [#allocation5], %s375_s24 }
  0x2f   : > { %p687_p12 = pnand %p368_p9, %p157_p11  ;;  %s149_s16 = sshll.u32 %s142_s14, 4  ;;  %s700_s16 = int_to_ptr.vmem [resolvable:$true] %s149_s16 }
  0x30   : > { %s139_s27 = scalar_lea.sflag [#allocation6], %s636_s22  ;;  %s461_s30 = scalar_lea.hbm %s696_s8, 1536 }
  0x31   : > { %p462_p3 = scmp.ne.s32.totalorder %s696_s8, %s461_s30  ;;  %s466_s23 = scalar_lea.hbm %s837_s1, 3072 }
  0x32   : > { %p467_p8 = scmp.lt.s32.totalorder %s696_s8, %s837_s1  ;;  %p468_p10 = scmp.lt.s32.totalorder %s466_s23, %s461_s30 }
  0x33   : > { %p464_p5 = pnand %p462_p3, %p435_p1 }
  0x34   : > { %p469_p0 = por %p468_p10, %p467_p8 }
  0x35   : > { %p465_p7 = pneg %p464_p5 }
  0x37   : > { %p470_p2 = pnand %p469_p0, %p465_p7 }
  0x39   : > { %473 = shalt.err (!%p470_p2)
}
  0x3a   : > { %s474_s22 = scalar_lea.vmem %s700_s16, 1536  ;;  %s562_s24 = smov [#allocation5]  }
  0x3b   : > { %p475_p4 = scmp.ne.s32.totalorder %s700_s16, %s474_s22  ;;  %s479_s6 = sshll.u32 %s562_s24, 4  ;;  %s480_s6 = int_to_ptr.vmem [resolvable:$false] %s479_s6 }
  0x3c   : > { %s481_s7 = scalar_lea.vmem %s480_s6, 3072  ;;  %p482_p3 = scmp.lt.s32.totalorder %s700_s16, %s480_s6 }
  0x3d   : > { %p477_p9 = pnand %p475_p4, %p435_p1  ;;  %p483_p5 = scmp.lt.s32.totalorder %s481_s7, %s474_s22 }
  0x3f   : > { %p478_p11 = pneg %p477_p9  ;;  %p484_p6 = por %p483_p5, %p482_p3 }
  0x41   : > { %p485_p8 = pnand %p484_p6, %p478_p11 }
  0x43   : > { %488 = shalt.err (!%p485_p8)
}
  0x44   : > { %390 = dma.hbm_to_vmem [thread:$0]  (!%p647_p13), %s696_s8, 1536, %s700_s16, %s139_s27, %s560_s29, %s560_s29, %s561_s4  }
  0x45   : > { %161 = sbr.rel (%p687_p12) target bundleno = 103 (0x67), region = 28  ;;  %s731_s14 = sand.u32 (!%p687_p12), 1, %s549_s10  }
  0x46   : > { %s377_s30 = smul.u32 (!%p687_p12), 96, %s731_s14  ;;  %s164_s3 = scalar_lea.sflag (!%p687_p12), [#allocation3], %s731_s14 }
  0x47   : > { %p846_p6 = scmp.ne.s32.totalorder (!%p687_p12), %s841_s19, 0 }
  0x48   : > { %s735_s17 = scalar_lea.vmem (!%p687_p12), [#allocation2], %s377_s30 }
  0x4a   : > { %532 = dma.done.wait (%p846_p6), %s164_s3, 1536  }
  0x4b   : > { %534 = vsyncadd (%p846_p6), %s164_s3, 4294965760  ;;  %s173_s28 = scalar_lea.sflag [#allocation6], %s731_s14  ;;  %s742_s29 = scalar_lea.vmem [#allocation5], %s377_s30 }
  0x4c   : > { %536 = dma.done.wait (%p846_p6), %s173_s28, 1536  }
  0x4d   : > { %538 = vsyncadd (%p846_p6), %s173_s28, 4294965760  ;;  %v205_v0 = vld [vmem:[%s735_s17] sm:$0xff]  ;;  %v206_v2 = vld [vmem:[%s735_s17 + $0x8] sm:$0xff]  ;;  %s757_s19 = scalar_lea.vmem [#allocation7], %s377_s30  ;;  %s374_s4 = smul.u32 1536, %s602_s13 }
  0x4e   : > { %v217_v1 = vld [vmem:[%s742_s29] sm:$0xff]  ;;  %v218_v4 = vld [vmem:[%s742_s29 + $0x8] sm:$0xff]  ;;  %v207_v5 = vld [vmem:[%s735_s17 + $0x10] sm:$0xff]  ;;  %s267_s5 = sshll.u32 %s757_s19, 4  ;;  %s254_s27 = scalar_lea.sflag [#allocation4], %s731_s14  ;;  %s783_s5 = int_to_ptr.vmem [resolvable:$true] %s267_s5 }
  0x4f   : > { %v229_v3 = vadd.f32 %v217_v1, %v205_v0  ;;  %v219_v6 = vld [vmem:[%s742_s29 + $0x10] sm:$0xff]  ;;  %v230_v7 = vadd.f32 %v218_v4, %v206_v2  ;;  %v208_v9 = vld [vmem:[%s735_s17 + $0x18] sm:$0xff]  ;;  %v209_v11 = vld [vmem:[%s735_s17 + $0x20] sm:$0xff]  ;;  %s790_s16 = scalar_lea.hbm %s838_s2, %s374_s4  ;;  %s489_s23 = scalar_lea.vmem %s783_s5, 1536 }
  0x50   : > { %v231_v8 = vadd.f32 %v219_v6, %v207_v5  ;;  %v220_v10 = vld [vmem:[%s742_s29 + $0x18] sm:$0xff]  ;;  %v221_v13 = vld [vmem:[%s742_s29 + $0x20] sm:$0xff]  ;;  %v210_v14 = vld [vmem:[%s735_s17 + $0x28] sm:$0xff]  ;;  %p490_p13 = scmp.ne.s32.totalorder %s783_s5, %s489_s23  ;;  %p847_p1 = scmp.ne.s32.totalorder %s842_s20, 0 }
  0x51   : > { %241 = vst [vmem:[%s757_s19] sm:$0xff] %v229_v3  ;;  %v232_v12 = vadd.f32 %v220_v10, %v208_v9  ;;  %v222_v15 = vld [vmem:[%s742_s29 + $0x28] sm:$0xff]  ;;  %242 = vst [vmem:[%s757_s19 + $0x8] sm:$0xff] %v230_v7  ;;  %v233_v16 = vadd.f32 %v221_v13, %v209_v11  ;;  %v211_v18 = vld [vmem:[%s735_s17 + $0x30] sm:$0xff]  ;;  %s563_s25 = smov [#allocation7]  }
  0x52   : > { %243 = vst [vmem:[%s757_s19 + $0x10] sm:$0xff] %v231_v8  ;;  %v234_v17 = vadd.f32 %v222_v15, %v210_v14  ;;  %v223_v19 = vld [vmem:[%s742_s29 + $0x30] sm:$0xff]  ;;  %v212_v20 = vld [vmem:[%s735_s17 + $0x38] sm:$0xff]  ;;  %v213_v23 = vld [vmem:[%s735_s17 + $0x40] sm:$0xff]  ;;  %p491_p12 = pnand %p490_p13, %p847_p1  ;;  %s493_s26 = sshll.u32 %s563_s25, 4  ;;  %s494_s26 = int_to_ptr.vmem [resolvable:$false] %s493_s26 }
  0x53   : > { %244 = vst [vmem:[%s757_s19 + $0x18] sm:$0xff] %v232_v12  ;;  %v235_v21 = vadd.f32 %v223_v19, %v211_v18  ;;  %v224_v22 = vld [vmem:[%s742_s29 + $0x38] sm:$0xff]  ;;  %v225_v24 = vld [vmem:[%s742_s29 + $0x40] sm:$0xff]  ;;  %245 = vst [vmem:[%s757_s19 + $0x20] sm:$0xff] %v233_v16  ;;  %s495_s22 = scalar_lea.vmem %s494_s26, 3072  ;;  %p496_p10 = scmp.lt.s32.totalorder %s783_s5, %s494_s26 }
  0x54   : > { %246 = vst [vmem:[%s757_s19 + $0x28] sm:$0xff] %v234_v17  ;;  %v236_v25 = vadd.f32 %v224_v22, %v212_v20  ;;  %v237_v26 = vadd.f32 %v225_v24, %v213_v23  ;;  %v214_v27 = vld [vmem:[%s735_s17 + $0x48] sm:$0xff]  ;;  %v215_v29 = vld [vmem:[%s735_s17 + $0x50] sm:$0xff]  ;;  %v216_v32 = vld [vmem:[%s735_s17 + $0x58] sm:$0xff]  ;;  %p492_p7 = pneg %p491_p12  ;;  %p497_p0 = scmp.lt.s32.totalorder %s495_s22, %s489_s23 }
  0x55   : > { %v226_v28 = vld [vmem:[%s742_s29 + $0x48] sm:$0xff]  ;;  %247 = vst [vmem:[%s757_s19 + $0x30] sm:$0xff] %v235_v21  ;;  %v227_v31 = vld [vmem:[%s742_s29 + $0x50] sm:$0xff]  ;;  %v228_v33 = vld [vmem:[%s742_s29 + $0x58] sm:$0xff] }
  0x56   : > { %v238_v30 = vadd.f32 %v226_v28, %v214_v27  ;;  %248 = vst [vmem:[%s757_s19 + $0x38] sm:$0xff] %v236_v25  ;;  %249 = vst [vmem:[%s757_s19 + $0x40] sm:$0xff] %v237_v26  ;;  %v239_v34 = vadd.f32 %v227_v31, %v215_v29  ;;  %v240_v35 = vadd.f32 %v228_v33, %v216_v32  ;;  %p498_p2 = por %p497_p0, %p496_p10 }
  0x58   : > { %250 = vst [vmem:[%s757_s19 + $0x48] sm:$0xff] %v238_v30  ;;  %251 = vst [vmem:[%s757_s19 + $0x50] sm:$0xff] %v239_v34  ;;  %p499_p4 = pnand %p498_p2, %p492_p7 }
  0x59   : > { %252 = vst [vmem:[%s757_s19 + $0x58] sm:$0xff] %v240_v35 }
  0x5a   : > { %502 = shalt.err (!%p499_p4)
}
  0x5b   : > { %s503_s24 = scalar_lea.hbm %s790_s16, 1536  ;;  %s507_s30 = scalar_lea.hbm %s838_s2, 3072 }
  0x5c   : > { %p504_p9 = scmp.ne.s32.totalorder %s790_s16, %s503_s24  ;;  %p508_p5 = scmp.lt.s32.totalorder %s790_s16, %s838_s2 }
  0x5d   : > { %p509_p8 = scmp.lt.s32.totalorder %s507_s30, %s503_s24 }
  0x5e   : > { %p505_p11 = pnand %p504_p9, %p847_p1 }
  0x5f   : > { %p510_p6 = por %p509_p8, %p508_p5 }
  0x60   : > { %p506_p3 = pneg %p505_p11 }
  0x62   : > { %p511_p13 = pnand %p510_p6, %p506_p3 }
  0x64   : > { %514 = shalt.err (!%p511_p13)
}
  0x65   : > { %s564_s28 = smov 128   ;;  %s565_s29 = smov 8  }
  0x66   : > { %382 = dma.vmem_to_hbm [thread:$0]  (%p847_p1), %s783_s5, 1536, %s790_s16, %s254_s27, %s564_s28, %s564_s28, %s565_s29  }
  0x67 PF: > { %s282_s19 = sand.u32 1, %s545_s9   ;;  %p848_p12 = scmp.ne.s32.totalorder %s843_s21, 0 }
  0x68   : > { %p849_p7 = scmp.ge.s32.totalorder %s557_s12, 2  ;;  %s283_s4 = scalar_lea.sflag [#allocation4], %s282_s19 }
  0x6a   : > { %p392_p10 = pnand %p849_p7, %p848_p12 }
  0x6c   : > { %p393_p0 = pneg %p392_p10 }
  0x6e   : > { %540 = dma.done.wait (%p393_p0), %s283_s4, 1536  }
  0x6f   : > { %542 = vsyncadd (%p393_p0), %s283_s4, 4294965760  ;;  %p18_p2 = scmp.ge.s32.totalorder %s606_s15, 4   ;;  %s850_s9 = smov %s549_s10 }
  0x70   : > { %s851_s10 = smov %s553_s11  ;;  %s852_s11 = smov %s618_s18 }
  0x71   : > { %s853_s12 = smov %s606_s15  ;;  %20 = sbr.rel (!%p18_p2) target bundleno = 7 (0x7), region = 86 }
  0x76   :  { %288 = vsyncpa [#allocation3], 1 }
  0x77   :  { %290 = vsyncpa [#allocation3 + $0x1], 1 }
  0x78   :  { %291 = vsyncpa [#allocation6], 1 }
  0x79   :  { %293 = vsyncpa [#allocation6 + $0x1], 1 }
  0x7a   :  { %294 = vsyncpa [#allocation4], 1 }
  0x7b   :  { %296 = vsyncpa [#allocation4 + $0x1], 1 }

</bundles_post_ra>
